<compile_context>
chip_gen: v7x
topology: tpu7x:2x2x1
jax: 0.10.0
libtpu: 0.0.40
codegen_flags: <defaults>
</compile_context>

<pallas_src>
import jax
import jax.numpy as jnp
from jax.experimental import pallas as pl
from jax.experimental.pallas import tpu as pltpu

C = 7             # input channels
RED = 4
C_RED = C // RED  # 1 (attention bottleneck)
H1 = 32           # fc1 out
H2 = 16           # fc2 out (embedding dim)
EPS = 1e-5        # BatchNorm eps


# --------------------------------------------------------------------------- #
# Kernel
# --------------------------------------------------------------------------- #
def hunet_kernel(hu_a_ref, hu_b_ref, pw_ref, pv_ref, pk_ref, out_ref):
    pw = pw_ref[...]                       # (33, 8) = [W1e | b1e]
    w1 = pw[:, 0:C]                        # (33, 7)  rows 0..31: bn0-folded fc1,
    b1 = pw[:, C:C + 1]                    # (33, 1)  row 32: abn1-folded attn lin1
    v_row = pv_ref[...]                    # (1, 33)  bn1*fc2*head[1:] collapsed (row 32 = 0)

    pk = pk_ref[...]                       # (8, 4)
    aw2 = pk[0:C, 0:1]                     # (7, 1)  attn Linear(1->7) weight
    abn2_s = pk[C:C + 1, 0:1]              # (1, 1)  attn BN(1) scale
    abn2_b = pk[C:C + 1, 1:2]              # (1, 1)  attn BN(1) shift
    head_w0 = pk[C:C + 1, 2:3]             # (1, 1)  head weight for d_hu
    head_b = pk[C:C + 1, 3:4]              # (1, 1)  head bias

    def branch(x):                         # x: (7, TB), feature-major
        # Main matmul: rows 0..31 = fc1(bn0(x)), row 32 = attn lin1(attn_bn1(x)).
        h = jnp.dot(w1, x, preferred_element_type=jnp.float32) + b1     # (33, TB)
        h = jnp.maximum(h, 0.0)                                         # ReLU (both paths)
        # d16 contribution via MXU (v_row[32] == 0 so the attn row is ignored).
        p = jnp.dot(v_row, h, preferred_element_type=jnp.float32)       # (1, TB)
        # Attention tail: BN(1) -> Linear(1->7) -> Sigmoid, then x + x*w.
        s = h[H1:H1 + 1, :] * abn2_s + abn2_b                           # (1, TB)
        w = jax.nn.sigmoid(aw2 * s)                                     # (7, TB)
        return p, x * (1.0 + w)

    p_a, a2 = branch(hu_a_ref[...])
    p_b, b2 = branch(hu_b_ref[...])

    # d_hu channel sum on the MXU with a ones-row instead of a sublane reduce.
    ones_row = jnp.ones((1, C), jnp.float32)
    d_hu = jnp.dot(ones_row, jnp.abs(b2 - a2),
                   preferred_element_type=jnp.float32)                  # (1, TB)

    out_ref[...] = jax.nn.sigmoid(d_hu * head_w0 + (p_b - p_a) + head_b)


# --------------------------------------------------------------------------- #
# Host-side parameter folding / packing
# --------------------------------------------------------------------------- #
def fold_bn(gamma, beta, mean, var):
    scale = gamma / jnp.sqrt(var + EPS)
    return scale, beta - mean * scale


def _round_up(x, m):
    return ((x + m - 1) // m) * m


def _pack_params(params):
    bn0_s, bn0_b = fold_bn(*params["bn0"])            # (7,)
    bn1_s, _bn1_b = fold_bn(*params["bn1"])           # (32,)  shift cancels in d16
    abn1_s, abn1_b = fold_bn(*params["attn_bn1"])     # (7,)
    abn2_s, abn2_b = fold_bn(*params["attn_bn2"])     # (1,)

    fc1_w = params["fc1_w"]                           # (32, 7)
    fc2_w = params["fc2_w"]                           # (16, 32)
    head_w = params["head_w"]                         # (1, 17)
    head_b = params["head_b"]                         # (1,)
    aw1 = params["attn_w1"][0]                        # (7,)  Linear(7->1) weight row
    aw2 = params["attn_w2"]                           # (7,1) Linear(1->7) weight col

    # Fold bn0 into fc1 and attn_bn1 into the attention Linear(7->1); stack the
    # attention row as row 32 of the packed weight so it rides the same matmul.
    W1 = fc1_w * bn0_s[None, :]                       # (32, 7)
    b1 = fc1_w @ bn0_b                                # (32,)
    aw1f = aw1 * abn1_s                               # (7,)
    s_bias = aw1 @ abn1_b                             # ()
    W1e = jnp.concatenate([W1, aw1f[None, :]], axis=0)                 # (33, 7)
    b1e = jnp.concatenate([b1, s_bias[None]], axis=0)                  # (33,)
    pw = jnp.concatenate([W1e, b1e[:, None]], axis=1).astype(jnp.float32)  # (33, 8)

    # Collapse bn1 scale + fc2 + head[:, 1:] (linear after the fc1 ReLU).  Row 32
    # gets a zero so the attention row never leaks into d16.
    v = (bn1_s[:, None] * fc2_w.T) @ head_w[0, 1:]                     # (32,)
    pv = jnp.concatenate([v, jnp.zeros((1,), v.dtype)])[None, :]
    pv = pv.astype(jnp.float32)                                        # (1, 33)

    pk7 = jnp.concatenate([aw2, jnp.zeros((C, 3), jnp.float32)], axis=1)   # (7, 4)
    pk1 = jnp.stack([abn2_s[0], abn2_b[0], head_w[0, 0], head_b[0]])[None, :]
    pk = jnp.concatenate([pk7, pk1], axis=0).astype(jnp.float32)           # (8, 4)
    return pw, pv, pk


# --------------------------------------------------------------------------- #
# Tile / generation heuristics and pallas_call wrapper
# --------------------------------------------------------------------------- #
def _device_defaults():
    try:
        kind = jax.devices()[0].device_kind.lower()
    except Exception:
        kind = ""
    # v5e / v6e: single TensorCore, 128 MiB VMEM -> allow bigger tiles, no split.
    single_tc = any(t in kind for t in ("v5e", "v5 lite", "v5lite", "v6"))
    max_tb = 32768 if single_tc else 16384
    return max_tb, single_tc


def _pick_tb(n, cap, single_tc):
    cap = max(128, (cap // 128) * 128)
    if n <= cap:
        if single_tc or n <= 256:
            return n                                   # one full-extent block
        # Dual-TC chips (v7x): two roughly equal lane-aligned steps.
        return min(cap, _round_up(-(-n // 2), 128))
    return cap


def hunet_forward(hu_a, hu_b, params, *, max_tb=None, feature_major=False):
    """hu_a, hu_b: (N, 7) float32 (or (7, N) if feature_major) -> (N, 1)."""
    pw, pv, pk = _pack_params(params)

    if feature_major:
        xa = jnp.asarray(hu_a, jnp.float32)           # (7, N)
        xb = jnp.asarray(hu_b, jnp.float32)
    else:
        # TODO(synk): have the producer emit feature-major (7, N) inputs so this
        # extra XLA transpose pass over HBM disappears on v5e/v6e.
        xa = jnp.asarray(hu_a, jnp.float32).T         # (7, N)
        xb = jnp.asarray(hu_b, jnp.float32).T

    n = xa.shape[1]
    default_tb, single_tc = _device_defaults()
    cap = max_tb if max_tb is not None else default_tb
    tb = _pick_tb(n, cap, single_tc)
    grid = (pl.cdiv(n, tb),)                          # ragged tail handled by Pallas

    row = lambda i: (0, i)                            # lane-tiled data
    bc = lambda i: (0, 0)                             # broadcast parameter blocks

    cost = pl.CostEstimate(
        flops=int(n) * 1140,                          # 2 big + 3 tiny matmuls + VPU
        transcendentals=int(n) * 15,                  # 14 attn sigmoids + 1 head
        bytes_accessed=int(n) * 60,                   # 2x(7,N) in + (1,N) out, f32
    )

    out = pl.pallas_call(
        hunet_kernel,
        out_shape=jax.ShapeDtypeStruct((1, n), jnp.float32),
        grid=grid,
        in_specs=[
            pl.BlockSpec((C, tb), row),
            pl.BlockSpec((C, tb), row),
            pl.BlockSpec(pw.shape, bc),
            pl.BlockSpec(pv.shape, bc),
            pl.BlockSpec(pk.shape, bc),
        ],
        out_specs=pl.BlockSpec((1, tb), row),
        compiler_params=pltpu.CompilerParams(
            dimension_semantics=("parallel",),
            vmem_limit_bytes=32 * 1024 * 1024,
        ),
        cost_estimate=cost,
    )(xa, xb, pw, pv, pk)

    return out.reshape(n, 1)


# --------------------------------------------------------------------------- #
# Parameter init + pure-JAX reference (mirrors the PyTorch module in eval mode)
# --------------------------------------------------------------------------- #
def init_params(key):
    ks = jax.random.split(key, 10)

    def linear_w(k, out_f, in_f):
        bound = 1.0 / (in_f ** 0.5)
        return jax.random.uniform(k, (out_f, in_f), jnp.float32, -bound, bound)

    def bn_params(k, c):
        k1, k2, k3, k4 = jax.random.split(k, 4)
        gamma = jax.random.uniform(k1, (c,), jnp.float32, 0.5, 1.5)
        beta = jax.random.uniform(k2, (c,), jnp.float32, -0.5, 0.5)
        mean = jax.random.uniform(k3, (c,), jnp.float32, -0.5, 0.5)
        var = jax.random.uniform(k4, (c,), jnp.float32, 0.5, 1.5)
        return gamma, beta, mean, var

    return {
        "attn_bn1": bn_params(ks[0], C),
        "attn_w1": linear_w(ks[1], C_RED, C),      # Linear(7 -> 1, bias=False)
        "attn_bn2": bn_params(ks[2], C_RED),
        "attn_w2": linear_w(ks[3], C, C_RED),      # Linear(1 -> 7, bias=False)
        "bn0": bn_params(ks[4], C),
        "fc1_w": linear_w(ks[5], H1, C),           # Linear(7 -> 32, bias=False)
        "bn1": bn_params(ks[6], H1),
        "fc2_w": linear_w(ks[7], H2, H1),          # Linear(32 -> 16, bias=False)
        "head_w": linear_w(ks[8], 1, H2 + 1),      # Linear(17 -> 1)
        "head_b": jax.random.uniform(ks[9], (1,), jnp.float32, -0.2, 0.2),
    }


def hunet_reference(hu_a, hu_b, params):
    """Pure-JAX reference of the PyTorch forward (eval mode, no folding)."""
    bn0_s, bn0_b = fold_bn(*params["bn0"])
    bn1_s, bn1_b = fold_bn(*params["bn1"])
    abn1_s, abn1_b = fold_bn(*params["attn_bn1"])
    abn2_s, abn2_b = fold_bn(*params["attn_bn2"])

    def embed16(x):
        x = x * bn0_s + bn0_b
        x = jnp.maximum(x @ params["fc1_w"].T, 0.0)
        x = x * bn1_s + bn1_b
        return x @ params["fc2_w"].T

    def attn(x):
        h = x * abn1_s + abn1_b
        h = jnp.maximum(h @ params["attn_w1"].T, 0.0)
        h = h * abn2_s + abn2_b
        return jax.nn.sigmoid(h @ params["attn_w2"].T)

    d16 = embed16(hu_b) - embed16(hu_a)
    a2 = hu_a + hu_a * attn(hu_a)
    b2 = hu_b + hu_b * attn(hu_b)
    d_hu = jnp.sum(jnp.abs(b2 - a2), axis=1, keepdims=True)
    feats = jnp.concatenate([d_hu, d16], axis=1)
    return jax.nn.sigmoid(feats @ params["head_w"].T + params["head_b"])


if __name__ == "__main__":
    key = jax.random.PRNGKey(0)
    k_params, k_a, k_b, k_a2, k_b2 = jax.random.split(key, 5)
    params = init_params(k_params)

    # Small batch, single full-extent block (no padding, no partial tiles).
    N = 96
    hu_a = jax.random.normal(k_a, (N, C), jnp.float32)
    hu_b = jax.random.normal(k_b, (N, C), jnp.float32)
    out = jax.block_until_ready(hunet_forward(hu_a, hu_b, params))
    ref = hunet_reference(hu_a, hu_b, params)
    assert out.shape == (N, 1)
    assert jnp.allclose(out, ref, rtol=1e-5, atol=1e-5), (out, ref)

    # Exercise the multi-step grid with a ragged tail block (production path).
    N2 = 200
    hu_a2 = jax.random.normal(k_a2, (N2, C), jnp.float32)
    hu_b2 = jax.random.normal(k_b2, (N2, C), jnp.float32)
    out2 = jax.block_until_ready(hunet_forward(hu_a2, hu_b2, params, max_tb=128))
    ref2 = hunet_reference(hu_a2, hu_b2, params)
    assert out2.shape == (N2, 1)
    assert jnp.allclose(out2, ref2, rtol=1e-5, atol=1e-5), (out2, ref2)

    print("KERNEL_OK")
</pallas_src>

<mosaic_0001>
module attributes {stable_mosaic.version = 11 : i64} {
  func.func @hunet_kernel(%arg0: i32, %arg1: memref<7x96xf32, #tpu.memory_space<vmem>>, %arg2: memref<7x96xf32, #tpu.memory_space<vmem>>, %arg3: memref<33x8xf32, #tpu.memory_space<vmem>>, %arg4: memref<1x33xf32, #tpu.memory_space<vmem>>, %arg5: memref<8x4xf32, #tpu.memory_space<vmem>>, %arg6: memref<1x96xf32, #tpu.memory_space<vmem>>) attributes {dimension_semantics = [#tpu.dimension_semantics<parallel>], iteration_bounds = array<i64: 1>, scalar_prefetch = 0 : i64, scratch_operands = 0 : i64, tpu.core_type = #tpu.core_type<tc>, window_params = [{transform_indices = @transform_0, window_bounds = array<i64: 7, 96>}, {transform_indices = @transform_1, window_bounds = array<i64: 7, 96>}, {pipeline_mode = #tpu.pipeline_mode<synchronous>, transform_indices = @transform_2, window_bounds = array<i64: 33, 8>}, {pipeline_mode = #tpu.pipeline_mode<synchronous>, transform_indices = @transform_3, window_bounds = array<i64: 1, 33>}, {pipeline_mode = #tpu.pipeline_mode<synchronous>, transform_indices = @transform_4, window_bounds = array<i64: 8, 4>}, {transform_indices = @transform_5, window_bounds = array<i64: 1, 96>}]} {
    %c0 = arith.constant 0 : index
    %c0_0 = arith.constant 0 : index
    %0 = vector.load %arg3[%c0, %c0_0] : memref<33x8xf32, #tpu.memory_space<vmem>>, vector<33x8xf32>
    %1 = vector.extract_strided_slice %0 {offsets = [0, 0], sizes = [33, 7], strides = [1, 1]} : vector<33x8xf32> to vector<33x7xf32>
    %2 = vector.extract_strided_slice %0 {offsets = [0, 7], sizes = [33, 1], strides = [1, 1]} : vector<33x8xf32> to vector<33x1xf32>
    %c0_1 = arith.constant 0 : index
    %c0_2 = arith.constant 0 : index
    %3 = vector.load %arg4[%c0_1, %c0_2] : memref<1x33xf32, #tpu.memory_space<vmem>>, vector<1x33xf32>
    %c0_3 = arith.constant 0 : index
    %c0_4 = arith.constant 0 : index
    %4 = vector.load %arg5[%c0_3, %c0_4] : memref<8x4xf32, #tpu.memory_space<vmem>>, vector<8x4xf32>
    %5 = vector.extract_strided_slice %4 {offsets = [0, 0], sizes = [7, 1], strides = [1, 1]} : vector<8x4xf32> to vector<7x1xf32>
    %6 = vector.extract_strided_slice %4 {offsets = [7, 0], sizes = [1, 1], strides = [1, 1]} : vector<8x4xf32> to vector<1x1xf32>
    %7 = vector.extract_strided_slice %4 {offsets = [7, 1], sizes = [1, 1], strides = [1, 1]} : vector<8x4xf32> to vector<1x1xf32>
    %8 = vector.extract_strided_slice %4 {offsets = [7, 2], sizes = [1, 1], strides = [1, 1]} : vector<8x4xf32> to vector<1x1xf32>
    %9 = vector.extract_strided_slice %4 {offsets = [7, 3], sizes = [1, 1], strides = [1, 1]} : vector<8x4xf32> to vector<1x1xf32>
    %c0_5 = arith.constant 0 : index
    %c0_6 = arith.constant 0 : index
    %10 = vector.load %arg1[%c0_5, %c0_6] : memref<7x96xf32, #tpu.memory_space<vmem>>, vector<7x96xf32>
    %cst = arith.constant dense<0.000000e+00> : vector<33x96xf32>
    %11 = tpu.matmul %1, %10, %cst {dimension_numbers = #tpu.dot_dimension_numbers<[1], [0], [0], [1], [0, 0, 1, 1], [], []>} : vector<33x7xf32>, vector<7x96xf32>, vector<33x96xf32> -> vector<33x96xf32>
    %12 = vector.broadcast %2 : vector<33x1xf32> to vector<33x96xf32>
    %13 = arith.addf %11, %12 : vector<33x96xf32>
    %cst_7 = arith.constant 0.000000e+00 : f32
    %14 = vector.broadcast %cst_7 : f32 to vector<33x96xf32>
    %15 = arith.maximumf %13, %14 : vector<33x96xf32>
    %cst_8 = arith.constant dense<0.000000e+00> : vector<1x96xf32>
    %16 = tpu.matmul %3, %15, %cst_8 {dimension_numbers = #tpu.dot_dimension_numbers<[1], [0], [0], [1], [0, 0, 1, 1], [], []>} : vector<1x33xf32>, vector<33x96xf32>, vector<1x96xf32> -> vector<1x96xf32>
    %17 = vector.extract_strided_slice %15 {offsets = [32, 0], sizes = [1, 96], strides = [1, 1]} : vector<33x96xf32> to vector<1x96xf32>
    %18 = vector.broadcast %6 : vector<1x1xf32> to vector<1x96xf32>
    %19 = arith.mulf %17, %18 : vector<1x96xf32>
    %20 = vector.broadcast %7 : vector<1x1xf32> to vector<1x96xf32>
    %21 = arith.addf %19, %20 : vector<1x96xf32>
    %22 = vector.broadcast %5 : vector<7x1xf32> to vector<7x96xf32>
    %23 = vector.broadcast %21 : vector<1x96xf32> to vector<7x96xf32>
    %24 = arith.mulf %22, %23 : vector<7x96xf32>
    %25 = arith.negf %24 : vector<7x96xf32>
    %26 = math.exp %25 : vector<7x96xf32>
    %cst_9 = arith.constant 1.000000e+00 : f32
    %27 = vector.broadcast %cst_9 : f32 to vector<7x96xf32>
    %28 = arith.addf %27, %26 : vector<7x96xf32>
    %29 = arith.divf %27, %28 : vector<7x96xf32>
    %cst_10 = arith.constant 1.000000e+00 : f32
    %30 = vector.broadcast %cst_10 : f32 to vector<7x96xf32>
    %31 = arith.addf %30, %29 : vector<7x96xf32>
    %32 = arith.mulf %10, %31 : vector<7x96xf32>
    %c0_11 = arith.constant 0 : index
    %c0_12 = arith.constant 0 : index
    %33 = vector.load %arg2[%c0_11, %c0_12] : memref<7x96xf32, #tpu.memory_space<vmem>>, vector<7x96xf32>
    %cst_13 = arith.constant dense<0.000000e+00> : vector<33x96xf32>
    %34 = tpu.matmul %1, %33, %cst_13 {dimension_numbers = #tpu.dot_dimension_numbers<[1], [0], [0], [1], [0, 0, 1, 1], [], []>} : vector<33x7xf32>, vector<7x96xf32>, vector<33x96xf32> -> vector<33x96xf32>
    %35 = vector.broadcast %2 : vector<33x1xf32> to vector<33x96xf32>
    %36 = arith.addf %34, %35 : vector<33x96xf32>
    %cst_14 = arith.constant 0.000000e+00 : f32
    %37 = vector.broadcast %cst_14 : f32 to vector<33x96xf32>
    %38 = arith.maximumf %36, %37 : vector<33x96xf32>
    %cst_15 = arith.constant dense<0.000000e+00> : vector<1x96xf32>
    %39 = tpu.matmul %3, %38, %cst_15 {dimension_numbers = #tpu.dot_dimension_numbers<[1], [0], [0], [1], [0, 0, 1, 1], [], []>} : vector<1x33xf32>, vector<33x96xf32>, vector<1x96xf32> -> vector<1x96xf32>
    %40 = vector.extract_strided_slice %38 {offsets = [32, 0], sizes = [1, 96], strides = [1, 1]} : vector<33x96xf32> to vector<1x96xf32>
    %41 = vector.broadcast %6 : vector<1x1xf32> to vector<1x96xf32>
    %42 = arith.mulf %40, %41 : vector<1x96xf32>
    %43 = vector.broadcast %7 : vector<1x1xf32> to vector<1x96xf32>
    %44 = arith.addf %42, %43 : vector<1x96xf32>
    %45 = vector.broadcast %5 : vector<7x1xf32> to vector<7x96xf32>
    %46 = vector.broadcast %44 : vector<1x96xf32> to vector<7x96xf32>
    %47 = arith.mulf %45, %46 : vector<7x96xf32>
    %48 = arith.negf %47 : vector<7x96xf32>
    %49 = math.exp %48 : vector<7x96xf32>
    %cst_16 = arith.constant 1.000000e+00 : f32
    %50 = vector.broadcast %cst_16 : f32 to vector<7x96xf32>
    %51 = arith.addf %50, %49 : vector<7x96xf32>
    %52 = arith.divf %50, %51 : vector<7x96xf32>
    %cst_17 = arith.constant 1.000000e+00 : f32
    %53 = vector.broadcast %cst_17 : f32 to vector<7x96xf32>
    %54 = arith.addf %53, %52 : vector<7x96xf32>
    %55 = arith.mulf %33, %54 : vector<7x96xf32>
    %cst_18 = arith.constant 1.000000e+00 : f32
    %56 = vector.broadcast %cst_18 : f32 to vector<1x7xf32>
    %57 = arith.subf %55, %32 : vector<7x96xf32>
    %58 = math.absf %57 : vector<7x96xf32>
    %cst_19 = arith.constant dense<0.000000e+00> : vector<1x96xf32>
    %59 = tpu.matmul %56, %58, %cst_19 {dimension_numbers = #tpu.dot_dimension_numbers<[1], [0], [0], [1], [0, 0, 1, 1], [], []>} : vector<1x7xf32>, vector<7x96xf32>, vector<1x96xf32> -> vector<1x96xf32>
    %60 = vector.broadcast %8 : vector<1x1xf32> to vector<1x96xf32>
    %61 = arith.mulf %59, %60 : vector<1x96xf32>
    %62 = arith.subf %39, %16 : vector<1x96xf32>
    %63 = arith.addf %61, %62 : vector<1x96xf32>
    %64 = vector.broadcast %9 : vector<1x1xf32> to vector<1x96xf32>
    %65 = arith.addf %63, %64 : vector<1x96xf32>
    %66 = arith.negf %65 : vector<1x96xf32>
    %67 = math.exp %66 : vector<1x96xf32>
    %cst_20 = arith.constant 1.000000e+00 : f32
    %68 = vector.broadcast %cst_20 : f32 to vector<1x96xf32>
    %69 = arith.addf %68, %67 : vector<1x96xf32>
    %70 = arith.divf %68, %69 : vector<1x96xf32>
    %c0_21 = arith.constant 0 : index
    %c0_22 = arith.constant 0 : index
    %71 = vector.load %arg6[%c0_21, %c0_22] : memref<1x96xf32, #tpu.memory_space<vmem>>, vector<1x96xf32>
    tpu.vector_store %arg6[%c0_21, %c0_22], %70 {strides = array<i32>} : memref<1x96xf32, #tpu.memory_space<vmem>>, vector<1x96xf32>,
    return
  }
  func.func @transform_0(%arg0: i32) -> (i32, i32) {
    %c0_i32 = arith.constant 0 : i32
    %c0_i32_0 = arith.constant 0 : i32
    return %c0_i32, %arg0 : i32, i32
  }
  func.func @transform_1(%arg0: i32) -> (i32, i32) {
    %c0_i32 = arith.constant 0 : i32
    %c0_i32_0 = arith.constant 0 : i32
    return %c0_i32, %arg0 : i32, i32
  }
  func.func @transform_2(%arg0: i32) -> (i32, i32) {
    %c0_i32 = arith.constant 0 : i32
    %c0_i32_0 = arith.constant 0 : i32
    %c0_i32_1 = arith.constant 0 : i32
    return %c0_i32, %c0_i32_0 : i32, i32
  }
  func.func @transform_3(%arg0: i32) -> (i32, i32) {
    %c0_i32 = arith.constant 0 : i32
    %c0_i32_0 = arith.constant 0 : i32
    %c0_i32_1 = arith.constant 0 : i32
    return %c0_i32, %c0_i32_0 : i32, i32
  }
  func.func @transform_4(%arg0: i32) -> (i32, i32) {
    %c0_i32 = arith.constant 0 : i32
    %c0_i32_0 = arith.constant 0 : i32
    %c0_i32_1 = arith.constant 0 : i32
    return %c0_i32, %c0_i32_0 : i32, i32
  }
  func.func @transform_5(%arg0: i32) -> (i32, i32) {
    %c0_i32 = arith.constant 0 : i32
    %c0_i32_0 = arith.constant 0 : i32
    return %c0_i32, %arg0 : i32, i32
  }
}

</mosaic_0001>

<bundles_post_ra>
// kernel: tpu_custom_call.1
= control target key start
LH: loop header
LB: loop body
LE: loop exit
PB: predicated region body
PF: predicated region fallthrough
CT: control target
= control target key end

     0   :  { %vm65_vm0 = vcmask 1046528   ;;  %v747_v2 = vmov 0.0   ;;  %vm748_vm1 = vmmov 0   ;;  %vm54_vm2 = vcmask 56320   ;;  %s945_s0 = inlined_call_operand.vmem [shape: f32[7,96], index: 0, kind: input, shape index: {}]   ;;  %s946_s1 = inlined_call_operand.vmem [shape: f32[7,96], index: 1, kind: input, shape index: {}]   ;;  %s947_s2 = inlined_call_operand.vmem [shape: f32[33,8], index: 2, kind: input, shape index: {}]   ;;  %s948_s3 = inlined_call_operand.vmem [shape: f32[1,33], index: 3, kind: input, shape index: {}]   ;;  %s949_s4 = inlined_call_operand.vmem [shape: f32[8,4], index: 4, kind: input, shape index: {}]   ;;  %s950_s5 = inlined_call_operand.hbm [shape: f32[1,96], index: 5, kind: output, shape index: {}]  }
   0x1   :  { %v790_v0 = vld [vmem:[%s945_s0] sm:$0x7f]  ;;  %617 = vmatprep.subr.mxu0 %v747_v2  ;;  %619 = vmatprep.mubr.msk.f32.mxu0 %vm748_vm1, %v747_v2  ;;  %v749_v3 = vmov 7  }
   0x2   :  { %v795_v1 = vld [vmem:[%s947_s2] sm:$0xff]  ;;  %618 = vmatpush3.msk.msra.mxu0 %vm65_vm0, %v790_v0  ;;  %704 = vset.pattern.permute.xlu0 %v749_v3 }
   0x3   :  { %10 = vsyncpa [#allocation3], 0  ;;  %620 = vmatmul.mubr.msk.f32.vlgmr.msra.gmra.mrb[0].mxu0 %vm54_vm2, %v795_v1  ;;  %31 = vperm.xlu0 %704, %v795_v1   ;;  %v810_v4 = vld [vmem:[%s947_s2 + $0x8] sm:$0xff]  ;;  %v815_v5 = vld [vmem:[%s947_s2 + $0x10] sm:$0xff]  ;;  %v750_v9 = vmov 0   ;;  %v751_v10 = vmov 1   ;;  %v256_v47 = vlaneseq }
   0x4   :  { %622 = vmatprep.mubr.msk.f32.mxu0 %vm748_vm1, %v747_v2  ;;  %705 = vset.pattern.permute.xlu1 %v749_v3  ;;  %v828_v6 = vld [vmem:[%s947_s2 + $0x18] sm:$0xff]  ;;  %v834_v7 = vld [vmem:[%s947_s2 + $0x20] sm:$0x1]  ;;  %v752_v11 = vmov 0.0|0.0   ;;  %vm168_vm3 = vcmask 1040384   ;;  %vm164_vm4 = vcmask 269312  }
   0x5   :  { %41 = vperm.xlu1 %705, %v815_v5   ;;  %644 = vmatprep.mubr.msk.f32.mxu1 %vm748_vm1, %v747_v2  ;;  %v842_v8 = vld [vmem:[%s949_s4] sm:$0xff]  ;;  %v753_v41 = vmov 2   ;;  %v754_v42 = vmov 3   ;;  %v257_v51 = vshrl.u32 %v256_v47, 7  ;;  %vm554_vm5 = vcmask 778240  }
   0x6   :  { %682 = vmatprep.subr.bf16.mxu1 %v752_v11  ;;  %688 = vmatprep.subr.bf16.mxu0 %v752_v11  ;;  %v878_v39 = vld [vmem:[%s948_s3] sm:$0x1] }
   0x7   :  { %623 = vmatmul.mubr.msk.f32.gmra.mrb[2].mxu0 %vm54_vm2, %v810_v4  ;;  %36 = vperm.xlu0 %704, %v810_v4   ;;  %v883_v40 = vld [vmem:[%s946_s1] sm:$0x7f]  ;;  %v258_v58 = vsub.s32 0, %v257_v51  ;;  %s756_s1 = smov [#allocation2]  }
   0x8   :  { %625 = vmatprep.mubr.msk.f32.mxu0 %vm748_vm1, %v747_v2  ;;  %s562_s3 = sshll.u32 %s756_s1, 4  ;;  %s563_s3 = int_to_ptr.vmem [resolvable:$true] %s562_s3 }
   0x9   :  { %46 = vperm.xlu1 %705, %v828_v6   ;;  %s723_s8 = scalar_lea.vmem %s563_s3, 16  ;;  %s727_s9 = scalar_lea.vmem %s563_s3, 32 }
   0xa   :  { %p724_p0 = scmp.ne.s32.totalorder %s563_s3, %s723_s8  ;;  %p728_p1 = scmp.lt.s32.totalorder %s563_s3, %s563_s3 }
   0xb   :  { %626 = vmatmul.mubr.msk.f32.gmra.mrb[4].mxu0 %vm54_vm2, %v815_v5  ;;  %51 = vperm.xlu0 %704, %v834_v7   ;;  %p729_p2 = scmp.lt.s32.totalorder %s727_s9, %s723_s8 }
   0xc   :  { %628 = vmatprep.mubr.msk.f32.mxu0 %vm748_vm1, %v747_v2 }
   0xd   :  { %706 = vset.pattern.permute.xlu1 %v750_v9  ;;  %p730_p3 = por %p729_p2, %p728_p1 }
   0xe   :  { %244 = vperm.xlu1 %706, %v842_v8  }
   0xf   :  { %629 = vmatmul.mubr.msk.f32.gmra.mrb[6].mxu0 %vm54_vm2, %v828_v6  ;;  %707 = vset.pattern.permute.xlu0 %v751_v10  ;;  %p731_p4 = pnand %p730_p3, %p724_p0 }
  0x10   :  { %631 = vmatprep.mubr.msk.f32.mxu0 %vm748_vm1, %v747_v2  ;;  %250 = vperm.xlu0 %707, %v842_v8  }
  0x12   :  { %708 = vset.pattern.permute.xlu1 %v753_v41 }
  0x13   :  { %632 = vmatmul.mubr.msk.f32.gmra.mrb[8].mxu0 %vm54_vm2, %v834_v7  ;;  %535 = vperm.xlu1 %708, %v842_v8  }
  0x14   :  { %674 = vmatprep.mubr.msk.f32.mxu0 %vm748_vm1, %v747_v2  ;;  %710 = vset.pattern.permute.xlu0 %v754_v42 }
  0x17   :  { %709 = vset.pattern.permute.xlu1 %v754_v42 }
  0x18   :  { %543 = vperm.xlu1 %709, %v842_v8  }
  0x82   :  { %v858_v12 = vpop.permute.xlu0 %31 }
  0x84   :  { %v864_v20 = vpop.permute.xlu1 %41 }
  0x86   :  { %v861_v16 = vpop.permute.xlu0 %36 }
  0x88   :  { %v867_v27 = vpop.permute.xlu1 %46 }
  0x8a   :  { %v871_v33 = vpop.permute.xlu0 %51 }
  0x8d   :  { %v245_v43 = vpop.permute.xlu1 %244 }
  0x8e   :  { %v246_v46 = vrot.slane %v245_v43, 7 }
  0x8f   :  { %v251_v48 = vpop.permute.xlu0 %250 }
  0x90   :  { %v252_v53 = vrot.slane %v251_v48, 7 }
  0xd6   :  { %v135_v13 = vpop.f32.mrb[0].mxu0 }
  0xd7   :  { %v621_v14 = vpop.f32.mrb[1].mxu0  ;;  %v136_v15 = vadd.f32 %v135_v13, %v858_v12 }
  0xd9   :  { %v159_v21 = vmax.f32 %v136_v15, 0.0 }
  0xda   :  { %v140_v17 = vpop.f32.mrb[2].mxu0 }
  0xdb   :  { %v141_v18 = vadd.f32 %v140_v17, %v861_v16  ;;  %v624_v19 = vpop.f32.mrb[3].mxu0 }
  0xdd   :  { %v160_v22 = vmax.f32 %v141_v18, 0.0 }
  0xde   :  { %v145_v23 = vpop.f32.mrb[4].mxu0 }
  0xdf   :  { %v627_v24 = vpop.f32.mrb[5].mxu0  ;;  %v683_v25 = vpack.c.bf16 %v160_v22, %v159_v21  ;;  %v146_v26 = vadd.f32 %v145_v23, %v864_v20 }
  0xe1   :  { %684 = vmatpush3.bf16.msra.mxu1 %v683_v25  ;;  %v161_v31 = vmax.f32 %v146_v26, 0.0 }
  0xe2   :  { %v150_v28 = vpop.f32.mrb[6].mxu0  ;;  %685 = vmatprep.subr.bf16.mxu1 %v752_v11 }
  0xe3   :  { %v151_v29 = vadd.f32 %v150_v28, %v867_v27  ;;  %v630_v30 = vpop.f32.mrb[7].mxu0 }
  0xe5   :  { %v162_v32 = vmax.f32 %v151_v29, 0.0 }
  0xe6   :  { %v155_v34 = vpop.f32.mrb[8].mxu0 }
  0xe7   :  { %v686_v35 = vpack.c.bf16 %v162_v32, %v161_v31  ;;  %v156_v36 = vadd.f32 %v155_v34, %v871_v33  ;;  %v633_v37 = vpop.f32.mrb[9].mxu0 }
  0xe8   :  { %v536_v37 = vpop.permute.xlu1 %535 }
  0xe9   :  { %687 = vmatpush3.bf16.msra.mxu1 %v686_v35  ;;  %v163_v38 = vmax.f32 %v156_v36, 0.0 }
  0xea   :  { %642 = vmatprep.subr.mxu1 %v747_v2 }
  0xeb   :  { %v248_v52 = vmul.f32 %v246_v46, %v163_v38 }
  0xed   :  { %643 = vmatpush3.msk.msra.mxu1 %vm168_vm3, %v163_v38  ;;  %v254_v59 = vadd.f32 %v252_v53, %v248_v52  ;;  %v537_v38 = vrot.slane %v536_v37, 7 }
  0xee   :  { %645 = vmatmul.mubr.msk.f32.vlgmr.msra.gmra.mrb[0].mxu1 %vm164_vm4, %v878_v39  ;;  %647 = vmatprep.subr.mxu1 %v747_v2 }
  0xef   :  { %648 = vmatpush3.msk.msra.mxu1 %vm65_vm0, %v883_v40  ;;  %649 = vmatprep.mubr.msk.f32.mxu1 %vm748_vm1, %v747_v2  ;;  %v259_v3 = vrot.slane %v254_v59, %v258_v58 }
  0xf1   :  { %v260_v8 = vmul.f32 %v259_v3, %v245_v43 }
  0xf2   :  { %650 = vmatmul.mubr.msk.f32.vlgmr.msra.gmra.mrb[2].mxu1 %vm54_vm2, %v795_v1 }
  0xf3   :  { %652 = vmatprep.mubr.msk.f32.mxu1 %vm748_vm1, %v747_v2 }
  0xf6   :  { %653 = vmatmul.mubr.msk.f32.gmra.mrb[4].mxu1 %vm54_vm2, %v810_v4 }
  0xf7   :  { %655 = vmatprep.mubr.msk.f32.mxu1 %vm748_vm1, %v747_v2 }
  0xfa   :  { %656 = vmatmul.mubr.msk.f32.gmra.mrb[6].mxu1 %vm54_vm2, %v815_v5 }
  0xfb   :  { %658 = vmatprep.mubr.msk.f32.mxu1 %vm748_vm1, %v747_v2 }
  0xfe   :  { %659 = vmatmul.mubr.msk.f32.gmra.mrb[8].mxu1 %vm54_vm2, %v828_v6 }
  0xff   :  { %661 = vmatprep.mubr.msk.f32.mxu1 %vm748_vm1, %v747_v2 }
 0x102   :  { %662 = vmatmul.mubr.msk.f32.gmra.mrb[10].mxu1 %vm54_vm2, %v834_v7 }
 0x1c1   :  { %v913_v44 = vpop.f32.mrb[0].mxu1 }
 0x1c2   :  { %v646_v45 = vpop.f32.mrb[1].mxu1 }
 0x1c5   :  { %v339_v49 = vpop.f32.mrb[2].mxu1 }
 0x1c6   :  { %v651_v50 = vpop.f32.mrb[3].mxu1  ;;  %v340_v54 = vadd.f32 %v339_v49, %v858_v12 }
 0x1c8   :  { %v363_v60 = vmax.f32 %v340_v54, 0.0 }
 0x1c9   :  { %v344_v55 = vpop.f32.mrb[4].mxu1 }
 0x1ca   :  { %v345_v56 = vadd.f32 %v344_v55, %v861_v16  ;;  %v654_v57 = vpop.f32.mrb[5].mxu1  ;;  %v578_v16 = vmul.f32 -1.442695, %v260_v8 }
 0x1cc   :  { %v364_v61 = vmax.f32 %v345_v56, 0.0  ;;  %711 = vpow2.f32 %v578_v16 }
 0x1cd   :  { %v349_v62 = vpop.f32.mrb[6].mxu1 }
 0x1ce   :  { %v689_v63 = vpack.c.bf16 %v364_v61, %v363_v60  ;;  %v657_v1 = vpop.f32.mrb[7].mxu1  ;;  %v350_v4 = vadd.f32 %v349_v62, %v864_v20 }
 0x1d0   :  { %690 = vmatpush3.bf16.msra.mxu0 %v689_v63  ;;  %v365_v9 = vmax.f32 %v350_v4, 0.0 }
 0x1d1   :  { %v354_v5 = vpop.f32.mrb[8].mxu1  ;;  %691 = vmatprep.subr.bf16.mxu0 %v752_v11 }
 0x1d2   :  { %v355_v6 = vadd.f32 %v354_v5, %v867_v27  ;;  %v660_v7 = vpop.f32.mrb[9].mxu1 }
 0x1d4   :  { %v366_v10 = vmax.f32 %v355_v6, 0.0 }
 0x1d5   :  { %v359_v12 = vpop.f32.mrb[10].mxu1 }
 0x1d6   :  { %v692_v13 = vpack.c.bf16 %v366_v10, %v365_v9  ;;  %v360_v14 = vadd.f32 %v359_v12, %v871_v33  ;;  %v663_v15 = vpop.f32.mrb[11].mxu1  ;;  %v712_v22 = vpop.eup %711 }
 0x1d7   :  { %v264_v23 = vadd.f32 1.0, %v712_v22 }
 0x1d8   :  { %v367_v17 = vmax.f32 %v360_v14, 0.0  ;;  %693 = vmatpush3.bf16.msra.mxu0 %v692_v13 }
 0x1d9   :  { %672 = vmatprep.subr.mxu0 %v747_v2 }
 0x1da   :  { %v441_v18 = vmul.f32 %v367_v17, %v246_v46 }
 0x1dc   :  { %v442_v19 = vadd.f32 %v441_v18, %v252_v53  ;;  %673 = vmatpush3.msk.msra.mxu0 %vm168_vm3, %v367_v17 }
 0x1dd   :  { %675 = vmatmul.mubr.msk.f32.vlgmr.msra.gmra.mrb[10].mxu0 %vm164_vm4, %v878_v39  ;;  %677 = vmatprep.subr.mxu0 %v747_v2  ;;  %v544_v39 = vpop.permute.xlu1 %543 }
 0x1de   :  { %v446_v11 = vrot.slane %v442_v19, %v258_v58  ;;  %679 = vmatprep.mubr.msk.f32.mxu0 %vm748_vm1, %v747_v2  ;;  %v755_v2 = vmov 1.0  }
 0x1e0   :  { %v447_v20 = vmul.f32 %v446_v11, %v245_v43  ;;  %v545_v43 = vrot.slane %v544_v39, 7 }
 0x1e2   :  { %v587_v21 = vmul.f32 -1.442695, %v447_v20 }
 0x1e4   :  { %713 = vpow2.f32 %v587_v21 }
 0x1e5   :  { %715 = vrcp.f32 %v264_v23 }
 0x1ee   :  { %v714_v24 = vpop.eup %713 }
 0x1ef   :  { %v451_v25 = vadd.f32 1.0, %v714_v24  ;;  %v716_v26 = vpop.eup %715 }
 0x1f0   :  { %v267_v27 = vadd.f32 1.0, %v716_v26 }
 0x1f1   :  { %717 = vrcp.f32 %v451_v25 }
 0x1f2   :  { %v268_v30 = vmul.f32 %v267_v27, %v790_v0 }
 0x1fb   :  { %v718_v28 = vpop.eup %717 }
 0x1fc   :  { %v454_v29 = vadd.f32 1.0, %v718_v28 }
 0x1fe   :  { %v455_v31 = vmul.f32 %v454_v29, %v883_v40 }
 0x200   :  { %v456_v32 = vsub.f32 %v455_v31, %v268_v30 }
 0x202   :  { %v457_v33 = vand.u32 2147483647, %v456_v32 }
 0x204   :  { %678 = vmatpush3.msk.msra.mxu0 %vm65_vm0, %v457_v33 }
 0x205   :  { %680 = vmatmul.mubr.msk.f32.vlgmr.msra.gmra.mrb[12].mxu0 %vm54_vm2, %v755_v2 }
 0x2b0   :  { %v437_v34 = vpop.f32.mrb[10].mxu0 }
 0x2b1   :  { %v540_v35 = vsub.f32 %v437_v34, %v913_v44  ;;  %v676_v36 = vpop.f32.mrb[11].mxu0 }
 0x2d8   :  { %v530_v41 = vpop.f32.mrb[12].mxu0 }
 0x2d9   :  { %v539_v42 = vmul.f32 %v537_v38, %v530_v41  ;;  %v681_v0 = vpop.f32.mrb[13].mxu0 }
 0x2db   :  { %v541_v45 = vadd.f32 %v540_v35, %v539_v42 }
 0x2dd   :  { %v547_v40 = vadd.f32 %v545_v43, %v541_v45 }
 0x2df   :  { %v590_v46 = vmul.f32 -1.442695, %v547_v40 }
 0x2e1   :  { %719 = vpow2.f32 %v590_v46 }
 0x2eb   :  { %v720_v47 = vpop.eup %719 }
 0x2ec   :  { %v551_v48 = vadd.f32 1.0, %v720_v47 }
 0x2ee   :  { %721 = vrcp.f32 %v551_v48 }
 0x2f8   :  { %v722_v44 = vpop.eup %721 }
 0x2f9   :  { %555 = vst.msk [vmem:[#allocation2] sm:$0x1] %vm554_vm5, %v722_v44 }
 0x2fa   :  { %734 = shalt.err (!%p731_p4)
}
 0x2fb   :  { %s735_s12 = scalar_lea.hbm %s950_s5, 16 }
 0x2fc   :  { %p736_p5 = scmp.ne.s32.totalorder %s950_s5, %s735_s12  ;;  %p739_p6 = scmp.lt.u32.totalorder %s735_s12, %s950_s5 }
 0x2fe   :  { %p741_p7 = pnand %p739_p6, %p736_p5 }
 0x300   :  { %744 = shalt.err (!%p741_p7)
}
 0x301   :  { %565 = dma.vmem_to_hbm [thread:$0]  %s563_s3, 16, %s950_s5, [#allocation3]  }
 0x302   :  { %745 = dma.done.wait [#allocation3], 16  }
 0x303   :  { %746 = vsyncadd [#allocation3], 4294967280 }
 0x304   :  { %569 = vsyncpa [#allocation3], 1 }

</bundles_post_ra>
